<compile_context>
chip_gen: v6e
topology: v6e:2x2x1
jax: 0.10.0
libtpu: 0.0.40
codegen_flags: <defaults>
</compile_context>

<pallas_src>
import jax
import jax.numpy as jnp
from jax import lax
from jax.experimental import pallas as pl
from jax.experimental.pallas import tpu as pltpu

BN_EPS = 1e-5
DIFF_POOL_EPS = 1e-15
LANE = 128


def _round_up(x, m):
    return ((x + m - 1) // m) * m


def _vmem_limit():
    # Per-generation VMEM budget: ~3/4 of physical (v5e/v6e 128 MiB, v7x 64 MiB).
    try:
        cap = int(pltpu.get_tpu_info().vmem_capacity_bytes)
        return max(32 << 20, (cap * 3) // 4)
    except Exception:
        return 48 << 20


# ----------------------------------------------------------------------------
# Kernel 1: fused x_pool + a_pool MLP (BN folded into W/b on the host).
#   layer 1: W1 = [W1_x | W1_a] column concat (shared x read, one dot)
#   layers 2/3: per-branch half-width dots (no zero-block multiplies)
#   output: lane-dense bf16 slab [ z (E) | s (C) | zero pad ] of width out_pad=128k
# ----------------------------------------------------------------------------
def fused_mlp_kernel(x_ref, w1_ref, b1_ref, w2x_ref, b2x_ref, w2a_ref, b2a_ref,
                     w3x_ref, b3x_ref, w3a_ref, b3a_ref, out_ref):
    x = x_ref[...]
    h1 = jnp.dot(x, w1_ref[...], preferred_element_type=jnp.float32) + b1_ref[...]
    h1 = jnp.maximum(h1, 0.0).astype(jnp.bfloat16)
    # TODO(synk): nn.Dropout is treated as identity (eval-mode semantics).
    half = w2x_ref.shape[0]  # 2E : x-branch half of the layer-1 output

    h2x = jnp.dot(h1[:, :half], w2x_ref[...],
                  preferred_element_type=jnp.float32) + b2x_ref[...]
    h2x = jnp.maximum(h2x, 0.0).astype(jnp.bfloat16)
    h2a = jnp.dot(h1[:, half:], w2a_ref[...],
                  preferred_element_type=jnp.float32) + b2a_ref[...]
    h2a = jnp.maximum(h2a, 0.0).astype(jnp.bfloat16)

    z = jnp.dot(h2x, w3x_ref[...], preferred_element_type=jnp.float32) + b3x_ref[...]
    s = jnp.dot(h2a, w3a_ref[...], preferred_element_type=jnp.float32) + b3a_ref[...]
    out_ref[...] = jnp.concatenate([z, s], axis=-1).astype(out_ref.dtype)


def fused_mlp_forward(x, fp, tile_n=1024):
    """x: [N, E] f32 -> bf16 slab [N, out_pad]; cols [0:E]=z, [E:E+C]=s, rest padding."""
    n, e = x.shape
    out_pad = fp['out_pad']
    tile_n = min(tile_n, _round_up(n, 8))

    weights = (fp['w1'], fp['b1'], fp['w2x'], fp['b2x'], fp['w2a'], fp['b2a'],
               fp['w3x'], fp['b3x'], fp['w3a'], fp['b3a'])
    wbytes = sum(int(w.size) * w.dtype.itemsize for w in weights)

    def wspec(arr):
        # Replicated (constant-index) blocks do not need double buffering; only
        # override when the weights are large enough for the VMEM saving to matter.
        if wbytes > (2 << 20):
            try:
                return pl.BlockSpec(arr.shape, lambda i: (0, 0),
                                    pipeline_mode=pl.Buffered(1))
            except Exception:
                pass
        return pl.BlockSpec(arr.shape, lambda i: (0, 0))

    grid_spec = pltpu.PrefetchScalarGridSpec(
        num_scalar_prefetch=0,
        grid=(pl.cdiv(n, tile_n),),
        in_specs=[pl.BlockSpec((tile_n, e), lambda i: (i, 0))]
                 + [wspec(w) for w in weights],
        out_specs=pl.BlockSpec((tile_n, out_pad), lambda i: (i, 0)),
    )
    return pl.pallas_call(
        fused_mlp_kernel,
        out_shape=jax.ShapeDtypeStruct((n, out_pad), jnp.bfloat16),
        grid_spec=grid_spec,
        compiler_params=pltpu.CompilerParams(
            dimension_semantics=("parallel",),
            vmem_limit_bytes=_vmem_limit()),
    )(x.astype(jnp.bfloat16), *weights)


# ----------------------------------------------------------------------------
# Kernel 2: dense_diff_pool, grid = (batch, node-row-tiles).
#   t==0  : masked softmax S for the whole graph -> VMEM scratch, entropy, zero accs
#   each t: out      += S_r^T Z_r
#           out_adj  += (S_r^T A_{r,:}) S
#           S^T S    += S_r^T S_r ,   ||A||^2 += sum(A_r^2)
#   last t: link_ssq = ||A||^2 - 2 tr(S^T A S) + ||S^T S||^2   (no [N,N] temporary)
# ----------------------------------------------------------------------------
def diff_pool_kernel(z_ref, adj_ref, s_ref, mask_ref,
                     out_ref, out_adj_ref, link_ref, ent_ref,
                     s_sc, sts_sc, asq_sc):
    t = pl.program_id(1)
    nt = pl.num_programs(1)
    tile = adj_ref.shape[1]

    @pl.when(t == 0)
    def _init():
        logits = s_ref[0].astype(jnp.float32)                      # [Np, C]
        m = jnp.max(logits, axis=-1, keepdims=True)
        ex = jnp.exp(logits - m)
        inv = pl.reciprocal(jnp.sum(ex, axis=-1, keepdims=True), approx=True)
        s = ex * inv * mask_ref[0]                                  # masked softmax
        s_sc[...] = s.astype(jnp.bfloat16)
        ent_ref[...] = jnp.reshape(
            jnp.sum(-s * jnp.log(s + DIFF_POOL_EPS)), (1, 1, 1))
        out_ref[...] = jnp.zeros_like(out_ref)
        out_adj_ref[...] = jnp.zeros_like(out_adj_ref)
        sts_sc[...] = jnp.zeros_like(sts_sc)
        asq_sc[...] = jnp.zeros_like(asq_sc)

    z = z_ref[0]                                                    # [tile, F]  bf16
    a = adj_ref[0]                                                  # [tile, Np] bf16
    row0 = pl.multiple_of(t * tile, 8)
    sr = s_sc[pl.ds(row0, tile), :]                                 # [tile, C]  bf16

    dn = (((0,), (0,)), ((), ()))                                   # contract node axis
    out_ref[0] = out_ref[0] + lax.dot_general(
        sr, z, dimension_numbers=dn, preferred_element_type=jnp.float32)
    sa = lax.dot_general(sr, a, dimension_numbers=dn,
                         preferred_element_type=jnp.float32)        # [C, Np] f32
    out_adj_ref[0] = out_adj_ref[0] + jnp.dot(
        sa, s_sc[...].astype(jnp.float32), preferred_element_type=jnp.float32)
    sts_sc[...] = sts_sc[...] + lax.dot_general(
        sr, sr, dimension_numbers=dn, preferred_element_type=jnp.float32)
    a32 = a.astype(jnp.float32)
    asq_sc[...] = asq_sc[...] + jnp.sum(a32 * a32)

    @pl.when(t == nt - 1)
    def _finalize():
        oa = out_adj_ref[0]                                         # [C, C]
        c = oa.shape[0]
        ir = lax.broadcasted_iota(jnp.int32, (c, c), 0)
        ic = lax.broadcasted_iota(jnp.int32, (c, c), 1)
        tr = jnp.sum(jnp.where(ir == ic, oa, 0.0))
        sts = sts_sc[...]
        ssq = asq_sc[...] - 2.0 * tr + jnp.sum(sts * sts)           # (1, 1)
        link_ref[...] = jnp.reshape(jnp.maximum(ssq, 0.0), (1, 1, 1))


def diff_pool_forward(dense_z, adj, dense_s, mask, tile_nm=1024):
    b, nmax, f = dense_z.shape
    c = dense_s.shape[-1]

    n8 = _round_up(nmax, 8)
    tile_nm = min(tile_nm, n8)
    # keep each bf16 adjacency row-block under ~8 MiB per pipeline buffer
    max_rows = max(8, (((8 << 20) // (n8 * 2)) // 8) * 8)
    tile_nm = min(tile_nm, max_rows)
    nmax_pad = _round_up(n8, tile_nm)
    nt = nmax_pad // tile_nm

    dz = dense_z.astype(jnp.bfloat16)
    ds = dense_s.astype(jnp.bfloat16)
    da = adj.astype(jnp.bfloat16)          # 0/1 entries: exact in bf16, half the HBM read
    mf = mask.astype(jnp.float32).reshape(b, nmax, 1)
    if nmax_pad != nmax:
        p = nmax_pad - nmax
        dz = jnp.pad(dz, ((0, 0), (0, p), (0, 0)))
        ds = jnp.pad(ds, ((0, 0), (0, p), (0, 0)))
        da = jnp.pad(da, ((0, 0), (0, p), (0, p)))
        mf = jnp.pad(mf, ((0, 0), (0, p), (0, 0)))

    grid_spec = pltpu.PrefetchScalarGridSpec(
        num_scalar_prefetch=0,
        grid=(b, nt),
        in_specs=[
            pl.BlockSpec((1, tile_nm, f), lambda i, t: (i, t, 0)),
            pl.BlockSpec((1, tile_nm, nmax_pad), lambda i, t: (i, t, 0)),
            pl.BlockSpec((1, nmax_pad, c), lambda i, t: (i, 0, 0)),
            pl.BlockSpec((1, nmax_pad, 1), lambda i, t: (i, 0, 0)),
        ],
        out_specs=[
            pl.BlockSpec((1, c, f), lambda i, t: (i, 0, 0)),
            pl.BlockSpec((1, c, c), lambda i, t: (i, 0, 0)),
            pl.BlockSpec((1, 1, 1), lambda i, t: (i, 0, 0)),
            pl.BlockSpec((1, 1, 1), lambda i, t: (i, 0, 0)),
        ],
        scratch_shapes=[
            pltpu.VMEM((nmax_pad, c), jnp.bfloat16),   # masked softmax S (whole graph)
            pltpu.VMEM((c, c), jnp.float32),           # S^T S accumulator
            pltpu.VMEM((1, 1), jnp.float32),           # ||A||^2 accumulator
        ],
    )
    out_shapes = (
        jax.ShapeDtypeStruct((b, c, f), jnp.float32),
        jax.ShapeDtypeStruct((b, c, c), jnp.float32),
        jax.ShapeDtypeStruct((b, 1, 1), jnp.float32),
        jax.ShapeDtypeStruct((b, 1, 1), jnp.float32),
    )
    out, out_adj, link_ssq, ent_sum = pl.pallas_call(
        diff_pool_kernel,
        out_shape=out_shapes,
        grid_spec=grid_spec,
        compiler_params=pltpu.CompilerParams(
            dimension_semantics=("parallel", "arbitrary"),
            vmem_limit_bytes=_vmem_limit()),
    )(dz, da, ds, mf)

    # normalizations use the ORIGINAL Nmax (to_dense_batch semantics), not the padded one
    link_loss = jnp.sqrt(jnp.maximum(jnp.sum(link_ssq), 0.0)) / float(b * nmax * nmax)
    ent_loss = jnp.sum(ent_sum) / float(b * nmax)
    return out, out_adj, link_loss, ent_loss


# ----------------------------------------------------------------------------
# Host-side parameter construction: init (PyTorch-like), BN fold, branch fusion
# ----------------------------------------------------------------------------
def init_linear(key, fan_in, fan_out):
    k1, k2 = jax.random.split(key)
    bound = 1.0 / (fan_in ** 0.5)
    w = jax.random.uniform(k1, (fan_in, fan_out), jnp.float32, -bound, bound)
    b = jax.random.uniform(k2, (1, fan_out), jnp.float32, -bound, bound)
    return w, b


def init_bn(dim):
    # gamma, beta, running_mean, running_var (PyTorch BatchNorm1d defaults)
    return (jnp.ones((1, dim), jnp.float32),
            jnp.zeros((1, dim), jnp.float32),
            jnp.zeros((1, dim), jnp.float32),
            jnp.ones((1, dim), jnp.float32))


def make_branch_params(key, emb_dim, out_dim):
    k1, k2, k3 = jax.random.split(key, 3)
    w1, b1 = init_linear(k1, emb_dim, emb_dim * 2)
    w2, b2 = init_linear(k2, emb_dim * 2, emb_dim * 4)
    w3, b3 = init_linear(k3, emb_dim * 4, out_dim)
    return dict(w1=w1, b1=b1, bn1=init_bn(emb_dim * 2),
                w2=w2, b2=b2, bn2=init_bn(emb_dim * 4),
                w3=w3, b3=b3)


def fold_bn(w, b, bn):
    """Fold eval-mode BatchNorm1d into the preceding Linear (exact)."""
    gamma, beta, mean, var = bn
    scale = gamma / jnp.sqrt(var + BN_EPS)
    return w * scale, (b - mean) * scale + beta


def fuse_branches(x_params, a_params, emb_dim, num_cluster):
    """Layer-1 column concat; layers 2/3 kept per-branch (half-width dots in-kernel);
    a-branch layer-3 padded so the concatenated output slab is 128-lane dense."""
    E, C = emb_dim, num_cluster
    w1x, b1x = fold_bn(x_params['w1'], x_params['b1'], x_params['bn1'])
    w2x, b2x = fold_bn(x_params['w2'], x_params['b2'], x_params['bn2'])
    w1a, b1a = fold_bn(a_params['w1'], a_params['b1'], a_params['bn1'])
    w2a, b2a = fold_bn(a_params['w2'], a_params['b2'], a_params['bn2'])
    w3x, b3x = x_params['w3'], x_params['b3']
    w3a, b3a = a_params['w3'], a_params['b3']

    w1 = jnp.concatenate([w1x, w1a], axis=1)          # [E, 4E]
    b1 = jnp.concatenate([b1x, b1a], axis=1)          # [1, 4E]

    out_pad = _round_up(E + C, LANE)
    pad_a = out_pad - E                                # padded a-branch output width
    w3a_p = jnp.zeros((4 * E, pad_a), jnp.float32).at[:, :C].set(w3a)
    b3a_p = jnp.zeros((1, pad_a), jnp.float32).at[:, :C].set(b3a)

    bf = jnp.bfloat16
    return dict(
        w1=w1.astype(bf), b1=b1,
        w2x=w2x.astype(bf), b2x=b2x, w2a=w2a.astype(bf), b2a=b2a,
        w3x=w3x.astype(bf), b3x=b3x, w3a=w3a_p.astype(bf), b3a=b3a_p,
        e=E, c=C, out_pad=out_pad)


# ----------------------------------------------------------------------------
# Plain-JAX glue: to_dense_batch / to_dense_adj (nodes assumed sorted by batch)
# ----------------------------------------------------------------------------
def to_dense(z, s, edge_index, batch, B, Nmax):
    N = batch.shape[0]
    counts = jnp.bincount(batch, length=B)
    starts = jnp.concatenate([jnp.zeros((1,), counts.dtype), jnp.cumsum(counts)[:-1]])
    pos = jnp.arange(N, dtype=batch.dtype) - starts[batch].astype(batch.dtype)

    dense_z = jnp.zeros((B, Nmax, z.shape[-1]), z.dtype).at[batch, pos].set(z)
    dense_s = jnp.zeros((B, Nmax, s.shape[-1]), s.dtype).at[batch, pos].set(s)
    mask = jnp.zeros((B, Nmax), dtype=bool).at[batch, pos].set(True)

    src, dst = edge_index[0], edge_index[1]
    adj = jnp.zeros((B, Nmax, Nmax), jnp.float32).at[
        batch[src], pos[src], pos[dst]].add(1.0)
    return dense_z, dense_s, adj, mask


def cluster_learner_forward(x, edge_index, batch, fused_params,
                            emb_dim, num_cluster, B, Nmax):
    zs = fused_mlp_forward(x, fused_params)            # [N, out_pad] bf16 slab
    z = zs[:, :emb_dim]                                # x_pool output
    s = zs[:, emb_dim:emb_dim + num_cluster]           # a_pool output (raw logits)
    dense_z, dense_s, adj, mask1 = to_dense(z, s, edge_index, batch, B, Nmax)
    out, out_adj, link_loss, ent_loss = diff_pool_forward(dense_z, adj, dense_s, mask1)
    return out, out_adj, link_loss, ent_loss, s.astype(jnp.float32), mask1


# ----------------------------------------------------------------------------
# Pure-JAX f32 reference (correctness check at the small example size)
# ----------------------------------------------------------------------------
def reference_forward(x, edge_index, batch, x_params, a_params, B, Nmax):
    def bn(v, p):
        g, be, m, var = p
        return (v - m) / jnp.sqrt(var + BN_EPS) * g + be

    def branch(p, h):
        h = jnp.maximum(bn(h @ p['w1'] + p['b1'], p['bn1']), 0.0)
        h = jnp.maximum(bn(h @ p['w2'] + p['b2'], p['bn2']), 0.0)
        return h @ p['w3'] + p['b3']

    s = branch(a_params, x)
    z = branch(x_params, x)
    dense_z, dense_s, adj, mask = to_dense(z, s, edge_index, batch, B, Nmax)
    mf = mask.astype(jnp.float32)[..., None]
    ss = jax.nn.softmax(dense_s, axis=-1) * mf
    zm = dense_z * mf
    out = jnp.einsum('bnc,bnf->bcf', ss, zm)
    out_adj = jnp.einsum('bnc,bnm,bmk->bck', ss, adj, ss)
    diff = adj - jnp.einsum('bnc,bmc->bnm', ss, ss)
    link = jnp.sqrt(jnp.sum(diff * diff)) / float(B * Nmax * Nmax)
    ent = jnp.mean(jnp.sum(-ss * jnp.log(ss + DIFF_POOL_EPS), axis=-1))
    return out, out_adj, link, ent, s, mask


# ----------------------------------------------------------------------------
if __name__ == "__main__":
    key = jax.random.PRNGKey(0)
    keys = jax.random.split(key, 3)

    emb_dim, num_cluster = 32, 4
    B, n_per_graph = 2, 8
    N = B * n_per_graph

    x = jax.random.normal(keys[0], (N, emb_dim), jnp.float32)
    batch = jnp.repeat(jnp.arange(B, dtype=jnp.int32), n_per_graph)

    # simple bidirectional ring within each graph
    src_list, dst_list = [], []
    for g in range(B):
        off = g * n_per_graph
        for i in range(n_per_graph):
            u, v = off + i, off + (i + 1) % n_per_graph
            src_list += [u, v]
            dst_list += [v, u]
    edge_index = jnp.array([src_list, dst_list], dtype=jnp.int32)

    x_params = make_branch_params(keys[1], emb_dim, emb_dim)        # x_pool -> emb_dim
    a_params = make_branch_params(keys[2], emb_dim, num_cluster)    # a_pool -> num_cluster
    fused_params = fuse_branches(x_params, a_params, emb_dim, num_cluster)

    out, out_adj, link_loss, ent_loss, s, mask1 = cluster_learner_forward(
        x, edge_index, batch, fused_params, emb_dim, num_cluster, B, n_per_graph)
    jax.block_until_ready((out, out_adj, link_loss, ent_loss, s, mask1))

    assert out.shape == (B, num_cluster, emb_dim)
    assert out_adj.shape == (B, num_cluster, num_cluster)
    assert s.shape == (N, num_cluster)
    assert mask1.shape == (B, n_per_graph)

    # correctness check against a pure-f32 JAX reference (kernel path is bf16 + f32 acc)
    r_out, r_adj, r_link, r_ent, r_s, r_mask = reference_forward(
        x, edge_index, batch, x_params, a_params, B, n_per_graph)

    def close(a, b, name, rtol=5e-2, atol=5e-2):
        assert jnp.allclose(jnp.asarray(a, jnp.float32), b, rtol=rtol, atol=atol), \
            f"mismatch: {name}"

    close(s, r_s, "s")
    close(out, r_out, "out")
    close(out_adj, r_adj, "out_adj")
    close(link_loss, r_link, "link_loss")
    close(ent_loss, r_ent, "ent_loss")
    assert bool(jnp.all(mask1 == r_mask))

    print("KERNEL_OK")
</pallas_src>

<mosaic_0001>
module attributes {stable_mosaic.version = 11 : i64} {
  func.func @fused_mlp_kernel(%arg0: i32, %arg1: memref<16x32xbf16, #tpu.memory_space<vmem>>, %arg2: memref<32x128xbf16, #tpu.memory_space<vmem>>, %arg3: memref<1x128xf32, #tpu.memory_space<vmem>>, %arg4: memref<64x128xbf16, #tpu.memory_space<vmem>>, %arg5: memref<1x128xf32, #tpu.memory_space<vmem>>, %arg6: memref<64x128xbf16, #tpu.memory_space<vmem>>, %arg7: memref<1x128xf32, #tpu.memory_space<vmem>>, %arg8: memref<128x32xbf16, #tpu.memory_space<vmem>>, %arg9: memref<1x32xf32, #tpu.memory_space<vmem>>, %arg10: memref<128x96xbf16, #tpu.memory_space<vmem>>, %arg11: memref<1x96xf32, #tpu.memory_space<vmem>>, %arg12: memref<16x128xbf16, #tpu.memory_space<vmem>>) attributes {dimension_semantics = [#tpu.dimension_semantics<parallel>], iteration_bounds = array<i64: 1>, scalar_prefetch = 0 : i64, scratch_operands = 0 : i64, tpu.core_type = #tpu.core_type<tc>, window_params = [{transform_indices = @transform_0, window_bounds = array<i64: 16, 32>}, {pipeline_mode = #tpu.pipeline_mode<synchronous>, transform_indices = @transform_1, window_bounds = array<i64: 32, 128>}, {pipeline_mode = #tpu.pipeline_mode<synchronous>, transform_indices = @transform_2, window_bounds = array<i64: 1, 128>}, {pipeline_mode = #tpu.pipeline_mode<synchronous>, transform_indices = @transform_3, window_bounds = array<i64: 64, 128>}, {pipeline_mode = #tpu.pipeline_mode<synchronous>, transform_indices = @transform_4, window_bounds = array<i64: 1, 128>}, {pipeline_mode = #tpu.pipeline_mode<synchronous>, transform_indices = @transform_5, window_bounds = array<i64: 64, 128>}, {pipeline_mode = #tpu.pipeline_mode<synchronous>, transform_indices = @transform_6, window_bounds = array<i64: 1, 128>}, {pipeline_mode = #tpu.pipeline_mode<synchronous>, transform_indices = @transform_7, window_bounds = array<i64: 128, 32>}, {pipeline_mode = #tpu.pipeline_mode<synchronous>, transform_indices = @transform_8, window_bounds = array<i64: 1, 32>}, {pipeline_mode = #tpu.pipeline_mode<synchronous>, transform_indices = @transform_9, window_bounds = array<i64: 128, 96>}, {pipeline_mode = #tpu.pipeline_mode<synchronous>, transform_indices = @transform_10, window_bounds = array<i64: 1, 96>}, {transform_indices = @transform_11, window_bounds = array<i64: 16, 128>}]} {
    %c0 = arith.constant 0 : index
    %c0_0 = arith.constant 0 : index
    %0 = vector.load %arg1[%c0, %c0_0] : memref<16x32xbf16, #tpu.memory_space<vmem>>, vector<16x32xbf16>
    %c0_1 = arith.constant 0 : index
    %c0_2 = arith.constant 0 : index
    %1 = vector.load %arg2[%c0_1, %c0_2] : memref<32x128xbf16, #tpu.memory_space<vmem>>, vector<32x128xbf16>
    %cst = arith.constant dense<0.000000e+00> : vector<16x128xf32>
    %2 = tpu.matmul %0, %1, %cst {dimension_numbers = #tpu.dot_dimension_numbers<[1], [0], [0], [1], [0, 0, 1, 1], [], []>} : vector<16x32xbf16>, vector<32x128xbf16>, vector<16x128xf32> -> vector<16x128xf32>
    %c0_3 = arith.constant 0 : index
    %c0_4 = arith.constant 0 : index
    %3 = vector.load %arg3[%c0_3, %c0_4] : memref<1x128xf32, #tpu.memory_space<vmem>>, vector<1x128xf32>
    %4 = vector.broadcast %3 : vector<1x128xf32> to vector<16x128xf32>
    %5 = arith.addf %2, %4 : vector<16x128xf32>
    %cst_5 = arith.constant 0.000000e+00 : f32
    %6 = vector.broadcast %cst_5 : f32 to vector<16x128xf32>
    %7 = arith.maximumf %5, %6 : vector<16x128xf32>
    %8 = arith.truncf %7 : vector<16x128xf32> to vector<16x128xbf16>
    %9 = vector.extract_strided_slice %8 {offsets = [0, 0], sizes = [16, 64], strides = [1, 1]} : vector<16x128xbf16> to vector<16x64xbf16>
    %c0_6 = arith.constant 0 : index
    %c0_7 = arith.constant 0 : index
    %10 = vector.load %arg4[%c0_6, %c0_7] : memref<64x128xbf16, #tpu.memory_space<vmem>>, vector<64x128xbf16>
    %cst_8 = arith.constant dense<0.000000e+00> : vector<16x128xf32>
    %11 = tpu.matmul %9, %10, %cst_8 {dimension_numbers = #tpu.dot_dimension_numbers<[1], [0], [0], [1], [0, 0, 1, 1], [], []>} : vector<16x64xbf16>, vector<64x128xbf16>, vector<16x128xf32> -> vector<16x128xf32>
    %c0_9 = arith.constant 0 : index
    %c0_10 = arith.constant 0 : index
    %12 = vector.load %arg5[%c0_9, %c0_10] : memref<1x128xf32, #tpu.memory_space<vmem>>, vector<1x128xf32>
    %13 = vector.broadcast %12 : vector<1x128xf32> to vector<16x128xf32>
    %14 = arith.addf %11, %13 : vector<16x128xf32>
    %cst_11 = arith.constant 0.000000e+00 : f32
    %15 = vector.broadcast %cst_11 : f32 to vector<16x128xf32>
    %16 = arith.maximumf %14, %15 : vector<16x128xf32>
    %17 = arith.truncf %16 : vector<16x128xf32> to vector<16x128xbf16>
    %18 = vector.extract_strided_slice %8 {offsets = [0, 64], sizes = [16, 64], strides = [1, 1]} : vector<16x128xbf16> to vector<16x64xbf16>
    %c0_12 = arith.constant 0 : index
    %c0_13 = arith.constant 0 : index
    %19 = vector.load %arg6[%c0_12, %c0_13] : memref<64x128xbf16, #tpu.memory_space<vmem>>, vector<64x128xbf16>
    %cst_14 = arith.constant dense<0.000000e+00> : vector<16x128xf32>
    %20 = tpu.matmul %18, %19, %cst_14 {dimension_numbers = #tpu.dot_dimension_numbers<[1], [0], [0], [1], [0, 0, 1, 1], [], []>} : vector<16x64xbf16>, vector<64x128xbf16>, vector<16x128xf32> -> vector<16x128xf32>
    %c0_15 = arith.constant 0 : index
    %c0_16 = arith.constant 0 : index
    %21 = vector.load %arg7[%c0_15, %c0_16] : memref<1x128xf32, #tpu.memory_space<vmem>>, vector<1x128xf32>
    %22 = vector.broadcast %21 : vector<1x128xf32> to vector<16x128xf32>
    %23 = arith.addf %20, %22 : vector<16x128xf32>
    %cst_17 = arith.constant 0.000000e+00 : f32
    %24 = vector.broadcast %cst_17 : f32 to vector<16x128xf32>
    %25 = arith.maximumf %23, %24 : vector<16x128xf32>
    %26 = arith.truncf %25 : vector<16x128xf32> to vector<16x128xbf16>
    %c0_18 = arith.constant 0 : index
    %c0_19 = arith.constant 0 : index
    %27 = vector.load %arg8[%c0_18, %c0_19] : memref<128x32xbf16, #tpu.memory_space<vmem>>, vector<128x32xbf16>
    %cst_20 = arith.constant dense<0.000000e+00> : vector<16x32xf32>
    %28 = tpu.matmul %17, %27, %cst_20 {dimension_numbers = #tpu.dot_dimension_numbers<[1], [0], [0], [1], [0, 0, 1, 1], [], []>} : vector<16x128xbf16>, vector<128x32xbf16>, vector<16x32xf32> -> vector<16x32xf32>
    %c0_21 = arith.constant 0 : index
    %c0_22 = arith.constant 0 : index
    %29 = vector.load %arg9[%c0_21, %c0_22] : memref<1x32xf32, #tpu.memory_space<vmem>>, vector<1x32xf32>
    %30 = vector.broadcast %29 : vector<1x32xf32> to vector<16x32xf32>
    %31 = arith.addf %28, %30 : vector<16x32xf32>
    %c0_23 = arith.constant 0 : index
    %c0_24 = arith.constant 0 : index
    %32 = vector.load %arg10[%c0_23, %c0_24] : memref<128x96xbf16, #tpu.memory_space<vmem>>, vector<128x96xbf16>
    %cst_25 = arith.constant dense<0.000000e+00> : vector<16x96xf32>
    %33 = tpu.matmul %26, %32, %cst_25 {dimension_numbers = #tpu.dot_dimension_numbers<[1], [0], [0], [1], [0, 0, 1, 1], [], []>} : vector<16x128xbf16>, vector<128x96xbf16>, vector<16x96xf32> -> vector<16x96xf32>
    %c0_26 = arith.constant 0 : index
    %c0_27 = arith.constant 0 : index
    %34 = vector.load %arg11[%c0_26, %c0_27] : memref<1x96xf32, #tpu.memory_space<vmem>>, vector<1x96xf32>
    %35 = vector.broadcast %34 : vector<1x96xf32> to vector<16x96xf32>
    %36 = arith.addf %33, %35 : vector<16x96xf32>
    %37 = tpu.concatenate %31, %36 in 1 : vector<16x32xf32>, vector<16x96xf32> -> vector<16x128xf32>
    %38 = arith.truncf %37 : vector<16x128xf32> to vector<16x128xbf16>
    %c0_28 = arith.constant 0 : index
    %c0_29 = arith.constant 0 : index
    %39 = vector.load %arg12[%c0_28, %c0_29] : memref<16x128xbf16, #tpu.memory_space<vmem>>, vector<16x128xbf16>
    tpu.vector_store %arg12[%c0_28, %c0_29], %38 {strides = array<i32>} : memref<16x128xbf16, #tpu.memory_space<vmem>>, vector<16x128xbf16>,
    return
  }
  func.func @transform_0(%arg0: i32) -> (i32, i32) {
    %c0_i32 = arith.constant 0 : i32
    %c0_i32_0 = arith.constant 0 : i32
    return %arg0, %c0_i32 : i32, i32
  }
  func.func @transform_1(%arg0: i32) -> (i32, i32) {
    %c0_i32 = arith.constant 0 : i32
    %c0_i32_0 = arith.constant 0 : i32
    %c0_i32_1 = arith.constant 0 : i32
    return %c0_i32, %c0_i32_0 : i32, i32
  }
  func.func @transform_2(%arg0: i32) -> (i32, i32) {
    %c0_i32 = arith.constant 0 : i32
    %c0_i32_0 = arith.constant 0 : i32
    %c0_i32_1 = arith.constant 0 : i32
    return %c0_i32, %c0_i32_0 : i32, i32
  }
  func.func @transform_3(%arg0: i32) -> (i32, i32) {
    %c0_i32 = arith.constant 0 : i32
    %c0_i32_0 = arith.constant 0 : i32
    %c0_i32_1 = arith.constant 0 : i32
    return %c0_i32, %c0_i32_0 : i32, i32
  }
  func.func @transform_4(%arg0: i32) -> (i32, i32) {
    %c0_i32 = arith.constant 0 : i32
    %c0_i32_0 = arith.constant 0 : i32
    %c0_i32_1 = arith.constant 0 : i32
    return %c0_i32, %c0_i32_0 : i32, i32
  }
  func.func @transform_5(%arg0: i32) -> (i32, i32) {
    %c0_i32 = arith.constant 0 : i32
    %c0_i32_0 = arith.constant 0 : i32
    %c0_i32_1 = arith.constant 0 : i32
    return %c0_i32, %c0_i32_0 : i32, i32
  }
  func.func @transform_6(%arg0: i32) -> (i32, i32) {
    %c0_i32 = arith.constant 0 : i32
    %c0_i32_0 = arith.constant 0 : i32
    %c0_i32_1 = arith.constant 0 : i32
    return %c0_i32, %c0_i32_0 : i32, i32
  }
  func.func @transform_7(%arg0: i32) -> (i32, i32) {
    %c0_i32 = arith.constant 0 : i32
    %c0_i32_0 = arith.constant 0 : i32
    %c0_i32_1 = arith.constant 0 : i32
    return %c0_i32, %c0_i32_0 : i32, i32
  }
  func.func @transform_8(%arg0: i32) -> (i32, i32) {
    %c0_i32 = arith.constant 0 : i32
    %c0_i32_0 = arith.constant 0 : i32
    %c0_i32_1 = arith.constant 0 : i32
    return %c0_i32, %c0_i32_0 : i32, i32
  }
  func.func @transform_9(%arg0: i32) -> (i32, i32) {
    %c0_i32 = arith.constant 0 : i32
    %c0_i32_0 = arith.constant 0 : i32
    %c0_i32_1 = arith.constant 0 : i32
    return %c0_i32, %c0_i32_0 : i32, i32
  }
  func.func @transform_10(%arg0: i32) -> (i32, i32) {
    %c0_i32 = arith.constant 0 : i32
    %c0_i32_0 = arith.constant 0 : i32
    %c0_i32_1 = arith.constant 0 : i32
    return %c0_i32, %c0_i32_0 : i32, i32
  }
  func.func @transform_11(%arg0: i32) -> (i32, i32) {
    %c0_i32 = arith.constant 0 : i32
    %c0_i32_0 = arith.constant 0 : i32
    return %arg0, %c0_i32 : i32, i32
  }
}

</mosaic_0001>

<bundles_post_ra>
// kernel: tpu_custom_call.1
= control target key start
LH: loop header
LB: loop body
LE: loop exit
PB: predicated region body
PF: predicated region fallthrough
CT: control target
= control target key end

     0   :  { %v761_v1 = vmov 0.0   ;;  %vm762_vm0 = vmmov 0   ;;  %vm70_vm1 = vcmask 261120   ;;  %s970_s0 = inlined_call_operand.vmem [shape: bf16[16,32], index: 0, kind: input, shape index: {}]   ;;  %s971_s1 = inlined_call_operand.vmem [shape: bf16[32,128], index: 1, kind: input, shape index: {}]   ;;  %s972_s2 = inlined_call_operand.vmem [shape: f32[1,128], index: 2, kind: input, shape index: {}]   ;;  %s973_s3 = inlined_call_operand.vmem [shape: bf16[64,128], index: 3, kind: input, shape index: {}]   ;;  %s974_s4 = inlined_call_operand.vmem [shape: f32[1,128], index: 4, kind: input, shape index: {}]   ;;  %s975_s5 = inlined_call_operand.vmem [shape: bf16[64,128], index: 5, kind: input, shape index: {}]   ;;  %s976_s6 = inlined_call_operand.vmem [shape: f32[1,128], index: 6, kind: input, shape index: {}]   ;;  %s977_s7 = inlined_call_operand.vmem [shape: bf16[128,32], index: 7, kind: input, shape index: {}]   ;;  %s978_s8 = inlined_call_operand.vmem [shape: f32[1,32], index: 8, kind: input, shape index: {}]   ;;  %s979_s9 = inlined_call_operand.vmem [shape: bf16[128,96], index: 9, kind: input, shape index: {}]   ;;  %s980_s10 = inlined_call_operand.vmem [shape: f32[1,96], index: 10, kind: input, shape index: {}]   ;;  %s981_s11 = inlined_call_operand.hbm [shape: bf16[16,128], index: 11, kind: output, shape index: {}]  }
   0x1   :  { %v712_v0 = vld [vmem:[%s971_s1 + $0x8] sm:$0xff]   ;;  %629 = vmatprep.subr.bf16.mxu0 %v761_v1  ;;  %637 = vmatprep.subr.bf16.mxu1 %v761_v1  ;;  %v713_v2 = vld [vmem:[%s971_s1] sm:$0xff]   ;;  %v715_v3 = vld [vmem:[%s973_s3 + $0x18] sm:$0xff]  }
   0x2   :  { %630 = vmatpush3.bf16.msra.mxu0 %v712_v0  ;;  %633 = vmatprep.mubr.msk.bf16.mxu0 %vm762_vm0, %v761_v1  ;;  %v714_v4 = vld [vmem:[%s970_s0] sm:$0xff]  }
   0x3   :  { %631 = vmatprep.subr.bf16.mxu0 %v761_v1  ;;  %645 = vmatprep.mubr.msk.bf16.mxu1 %vm762_vm0, %v761_v1 }
   0x4   :  { %638 = vmatpush3.bf16.msra.mxu1 %v715_v3 }
   0x5   :  { %639 = vmatprep.subr.bf16.mxu1 %v761_v1 }
   0x6   :  { %632 = vmatpush3.bf16.msra.mxu0 %v713_v2 }
   0x7   :  { %649 = vmatprep.subr.bf16.mxu0 %v761_v1 }
   0x9   :  { %634 = vmatmul.mubr.msk.bf16.vlgmr.msra.gmra.mxu0 %vm70_vm1, %v714_v4 }
   0xa   :  { %657 = vmatprep.mubr.msk.bf16.mxu0 %vm762_vm0, %v761_v1 }
   0xb   :  { %16 = vsyncpa [#allocation3], 0  ;;  %v716_v5 = vld [vmem:[%s973_s3 + $0x10] sm:$0xff]   ;;  %v717_v6 = vld [vmem:[%s973_s3 + $0x8] sm:$0xff]   ;;  %vm157_vm2 = vcmask 523264   ;;  %s763_s20 = smov 64  }
   0xc   :  { %640 = vmatpush3.bf16.msra.mxu1 %v716_v5  ;;  %v718_v7 = vld [vmem:[%s973_s3] sm:$0xff]   ;;  %v719_v8 = vld [vmem:[%s975_s5 + $0x18] sm:$0xff]   ;;  %v720_v9 = vld [vmem:[%s975_s5 + $0x10] sm:$0xff]   ;;  %s765_s30 = smov [#allocation2]  }
   0xd   :  { %641 = vmatprep.subr.bf16.mxu1 %v761_v1  ;;  %650 = vmatpush3.bf16.msra.mxu0 %v719_v8  ;;  %v721_v10 = vld [vmem:[%s975_s5 + $0x8] sm:$0xff]   ;;  %v722_v11 = vld [vmem:[%s975_s5] sm:$0xff]   ;;  %v723_v21 = vld [vmem:[%s977_s7 + $0x38] sm:$0xff]   ;;  %s543_s12 = sshll.u32 %s765_s30, 4  ;;  %s544_s12 = int_to_ptr.vmem [resolvable:$true] %s543_s12 }
   0xe   :  { %651 = vmatprep.subr.bf16.mxu0 %v761_v1  ;;  %v554_v12 = vld [vmem:[%s972_s2] ss:$0 sm:$0xff]  ;;  %v724_v23 = vld [vmem:[%s977_s7 + $0x30] sm:$0xff]   ;;  %v725_v24 = vld [vmem:[%s977_s7 + $0x28] sm:$0xff]   ;;  %p744_p1 = scmp.lt.s32.totalorder %s544_s12, %s544_s12 }
   0xf   :  { %v726_v25 = vld [vmem:[%s977_s7 + $0x20] sm:$0xff]   ;;  %v727_v26 = vld [vmem:[%s977_s7 + $0x18] sm:$0xff]   ;;  %v728_v27 = vld [vmem:[%s977_s7 + $0x10] sm:$0xff]  }
  0x10   :  { %642 = vmatpush3.bf16.msra.mxu1 %v717_v6  ;;  %v729_v28 = vld [vmem:[%s977_s7 + $0x8] sm:$0xff]   ;;  %v730_v29 = vld [vmem:[%s977_s7] sm:$0xff]   ;;  %v731_v30 = vld [vmem:[%s979_s9 + $0x38] sm:$0xff]  }
  0x11   :  { %643 = vmatprep.subr.bf16.mxu1 %v761_v1  ;;  %652 = vmatpush3.bf16.msra.mxu0 %v720_v9  ;;  %v732_v32 = vld [vmem:[%s979_s9 + $0x30] sm:$0xff]   ;;  %v733_v33 = vld [vmem:[%s979_s9 + $0x28] sm:$0xff]   ;;  %v734_v34 = vld [vmem:[%s979_s9 + $0x20] sm:$0xff]  }
  0x12   :  { %653 = vmatprep.subr.bf16.mxu0 %v761_v1  ;;  %v735_v35 = vld [vmem:[%s979_s9 + $0x18] sm:$0xff]   ;;  %v736_v36 = vld [vmem:[%s979_s9 + $0x10] sm:$0xff]   ;;  %v737_v37 = vld [vmem:[%s979_s9 + $0x8] sm:$0xff]  }
  0x13   :  { %v738_v38 = vld [vmem:[%s979_s9] sm:$0xff]  }
  0x14   :  { %644 = vmatpush3.bf16.msra.mxu1 %v718_v7  ;;  %v559_v39 = vld [vmem:[%s974_s4] ss:$0 sm:$0xff] }
  0x15   :  { %661 = vmatprep.subr.bf16.mxu1 %v761_v1  ;;  %654 = vmatpush3.bf16.msra.mxu0 %v721_v10  ;;  %v565_v49 = vld [vmem:[%s976_s6] ss:$0 sm:$0xff]  ;;  %s764_s6 = smov 32  }
  0x16   :  { %655 = vmatprep.subr.bf16.mxu0 %v761_v1  ;;  %v580_v0 = vld [vmem:[%s980_s10] ss:$0 sm:$0xff]  ;;  %s739_s10 = scalar_lea.vmem %s544_s12, 128 }
  0x17   :  { %v571_v7 = vld [vmem:[%s978_s8] ss:$0 sm:$0xff]  ;;  %p740_p0 = scmp.ne.s32.totalorder %s544_s12, %s739_s10  ;;  %p745_p2 = scmp.lt.s32.totalorder %s739_s10, %s739_s10 }
  0x19   :  { %656 = vmatpush3.bf16.msra.mxu0 %v722_v11  ;;  %p746_p3 = por %p745_p2, %p744_p1 }
  0x1a   :  { %681 = vmatprep.subr.bf16.mxu0 %v761_v1 }
  0x1b   :  { %p747_p4 = pnand %p746_p3, %p740_p0 }
  0xc9   :  { %v108_v13 = vpop.f32.mrf.mxu0 }
  0xca   :  { %v109_v15 = vadd.f32 %v554_v12, %v108_v13 }
  0xcb   :  { %v635_v14 = vpop.f32.mrf.mxu0 }
  0xcc   :  { %v115_v19 = vmax.f32 %v109_v15, 0.0 }
  0xcd   :  { %v111_v16 = vpop.f32.mrf.mxu0 }
  0xce   :  { %v112_v17 = vadd.f32 %v554_v12, %v111_v16 }
  0xcf   :  { %v636_v18 = vpop.f32.mrf.mxu0 }
  0xd0   :  { %v116_v20 = vmax.f32 %v112_v17, 0.0 }
  0xd2   :  { %v117_v22 = vpack.c.bf16 %v116_v20, %v115_v19 }
  0xd4   :  { %221 = vrot.lane.b32.xlu0 %v117_v22, %s763_s20  ;;  %646 = vmatmul.mubr.msk.bf16.vlgmr.msra.gmra.mxu1 %vm157_vm2, %v117_v22 }
  0xd5   :  { %662 = vmatpush3.bf16.msra.mxu1 %v723_v21  ;;  %677 = vmatprep.mubr.msk.bf16.mxu1 %vm762_vm0, %v761_v1 }
  0xd6   :  { %663 = vmatprep.subr.bf16.mxu1 %v761_v1 }
  0xd9   :  { %664 = vmatpush3.bf16.msra.mxu1 %v724_v23 }
  0xda   :  { %665 = vmatprep.subr.bf16.mxu1 %v761_v1 }
  0xdd   :  { %666 = vmatpush3.bf16.msra.mxu1 %v725_v24 }
  0xde   :  { %667 = vmatprep.subr.bf16.mxu1 %v761_v1 }
  0xe1   :  { %668 = vmatpush3.bf16.msra.mxu1 %v726_v25 }
  0xe2   :  { %669 = vmatprep.subr.bf16.mxu1 %v761_v1 }
  0xe5   :  { %670 = vmatpush3.bf16.msra.mxu1 %v727_v26 }
  0xe6   :  { %671 = vmatprep.subr.bf16.mxu1 %v761_v1 }
  0xe9   :  { %672 = vmatpush3.bf16.msra.mxu1 %v728_v27 }
  0xea   :  { %673 = vmatprep.subr.bf16.mxu1 %v761_v1 }
  0xed   :  { %674 = vmatpush3.bf16.msra.mxu1 %v729_v28 }
  0xee   :  { %675 = vmatprep.subr.bf16.mxu1 %v761_v1 }
  0xf1   :  { %676 = vmatpush3.bf16.msra.mxu1 %v730_v29 }
 0x146   :  { %v222_v31 = vpop.permute.xlu0 %221 }
 0x147   :  { %658 = vmatmul.mubr.msk.bf16.vlgmr.msra.gmra.mxu0 %vm157_vm2, %v222_v31 }
 0x148   :  { %682 = vmatpush3.bf16.msra.mxu0 %v731_v30  ;;  %697 = vmatprep.mubr.msk.bf16.mxu0 %vm762_vm0, %v761_v1 }
 0x149   :  { %683 = vmatprep.subr.bf16.mxu0 %v761_v1 }
 0x14c   :  { %684 = vmatpush3.bf16.msra.mxu0 %v732_v32 }
 0x14d   :  { %685 = vmatprep.subr.bf16.mxu0 %v761_v1 }
 0x150   :  { %686 = vmatpush3.bf16.msra.mxu0 %v733_v33 }
 0x151   :  { %687 = vmatprep.subr.bf16.mxu0 %v761_v1 }
 0x154   :  { %688 = vmatpush3.bf16.msra.mxu0 %v734_v34 }
 0x155   :  { %689 = vmatprep.subr.bf16.mxu0 %v761_v1 }
 0x158   :  { %690 = vmatpush3.bf16.msra.mxu0 %v735_v35 }
 0x159   :  { %691 = vmatprep.subr.bf16.mxu0 %v761_v1 }
 0x15c   :  { %692 = vmatpush3.bf16.msra.mxu0 %v736_v36 }
 0x15d   :  { %693 = vmatprep.subr.bf16.mxu0 %v761_v1 }
 0x160   :  { %694 = vmatpush3.bf16.msra.mxu0 %v737_v37 }
 0x161   :  { %695 = vmatprep.subr.bf16.mxu0 %v761_v1 }
 0x164   :  { %696 = vmatpush3.bf16.msra.mxu0 %v738_v38 }
 0x194   :  { %v195_v40 = vpop.f32.mrf.mxu1 }
 0x195   :  { %v196_v42 = vadd.f32 %v559_v39, %v195_v40 }
 0x196   :  { %v647_v41 = vpop.f32.mrf.mxu1 }
 0x197   :  { %v202_v46 = vmax.f32 %v196_v42, 0.0 }
 0x198   :  { %v198_v43 = vpop.f32.mrf.mxu1 }
 0x199   :  { %v199_v44 = vadd.f32 %v559_v39, %v198_v43 }
 0x19a   :  { %v648_v45 = vpop.f32.mrf.mxu1 }
 0x19b   :  { %v203_v47 = vmax.f32 %v199_v44, 0.0 }
 0x19d   :  { %v204_v48 = vpack.c.bf16 %v203_v47, %v202_v46 }
 0x19f   :  { %678 = vmatmul.mubr.bf16.vlgmr.msra.gmra.mxu1 %v204_v48 }
 0x207   :  { %v284_v50 = vpop.f32.mrf.mxu0 }
 0x208   :  { %v285_v52 = vadd.f32 %v565_v49, %v284_v50 }
 0x209   :  { %v659_v51 = vpop.f32.mrf.mxu0 }
 0x20a   :  { %v291_v56 = vmax.f32 %v285_v52, 0.0 }
 0x20b   :  { %v287_v53 = vpop.f32.mrf.mxu0 }
 0x20c   :  { %v288_v54 = vadd.f32 %v565_v49, %v287_v53 }
 0x20d   :  { %v660_v55 = vpop.f32.mrf.mxu0 }
 0x20e   :  { %v292_v57 = vmax.f32 %v288_v54, 0.0 }
 0x210   :  { %v293_v58 = vpack.c.bf16 %v292_v57, %v291_v56 }
 0x212   :  { %698 = vmatmul.mubr.bf16.vlgmr.msra.gmra.mxu0 %v293_v58 }
 0x25f   :  { %v399_v59 = vpop.f32.mrf.mxu1 }
 0x260   :  { %v400_v9 = vadd.f32 %v571_v7, %v399_v59 }
 0x261   :  { %v679_v60 = vpop.f32.mrf.mxu1 }
 0x263   :  { %v402_v61 = vpop.f32.mrf.mxu1 }
 0x264   :  { %v403_v10 = vadd.f32 %v571_v7, %v402_v61 }
 0x265   :  { %v680_v62 = vpop.f32.mrf.mxu1 }
 0x2d2   :  { %v511_v63 = vpop.f32.mrf.mxu0 }
 0x2d3   :  { %v512_v3 = vadd.f32 %v580_v0, %v511_v63 }
 0x2d4   :  { %v699_v1 = vpop.f32.mrf.mxu0 }
 0x2d6   :  { %v514_v2 = vpop.f32.mrf.mxu0 }
 0x2d7   :  { %v515_v4 = vadd.f32 %v580_v0, %v514_v2 }
 0x2d8   :  { %v700_v5 = vpop.f32.mrf.mxu0 }
 0x2d9   :  { %v707_v6 = vpack.i.bf16 %v515_v4, %v512_v3 }
 0x2db   :  { %708 = vrot.lane.b32.xlu0 %v707_v6, %s764_s6 }
 0x34d   :  { %v709_v8 = vpop.permute.xlu0 %708 }
 0x34e   :  { %v711_v11 = vunpack.i.h.bf16 %v709_v8  ;;  %v710_v12 = vunpack.i.l.bf16 %v709_v8 }
 0x350   :  { %v527_v13 = vsel %vm70_vm1, %v403_v10, %v711_v11  ;;  %v526_v14 = vsel %vm70_vm1, %v400_v9, %v710_v12 }
 0x351   :  { %v596_v15 = vpack.c.bf16 %v527_v13, %v526_v14 }
 0x353   :  { %597 = vst [vmem:[#allocation2] sm:$0xff] %v596_v15  }
 0x354   :  { %750 = shalt.err (!%p747_p4)
}
 0x355   :  { %s766_s8 = smov 4  }
 0x356   :  { %549 = dma.vmem_to_hbm [thread:$0]  %s544_s12, 128, %s981_s11, [#allocation3], %s763_s20, %s763_s20, %s766_s8  }
 0x357   :  { %759 = dma.done.wait [#allocation3], 128  }
 0x358   :  { %760 = vsyncadd [#allocation3], 4294967168 }
 0x359   :  { %553 = vsyncpa [#allocation3], 1 }

</bundles_post_ra>
